<compile_context>
chip_gen: v7x
topology: tpu7x:2x2x1
jax: 0.10.0
libtpu: 0.0.40
codegen_flags: <defaults>
</compile_context>

<pallas_src>
import functools

import jax
import jax.numpy as jnp
from jax.experimental import pallas as pl
from jax.experimental.pallas import tpu as pltpu

_LANES = 128
_MAX_BLOCK_ROWS = 512     # 512 x 128 f32 = 256 KiB output per grid step
_SWEEP_MAX_N = 512        # table-sweep vs vector-gather threshold


def _round_up(x, m):
    return ((x + m - 1) // m) * m


def _sweep_kernel(n, idx_ref, bias_ref, o_ref):
    """out = bias[idx] via an n-pass table sweep (pure VPU, no gather op)."""
    idx = idx_ref[...]                                     # (BR, 128) int32, VMEM
    # k == 0 (and any out-of-range / padding index) -> bias[0].
    acc = jnp.full(idx.shape, bias_ref[0], dtype=jnp.float32)
    for k in range(1, n):                                  # unrolled at trace time
        acc = jnp.where(idx == k, bias_ref[k], acc)
    o_ref[...] = acc


def _take_kernel(idx_ref, bias_ref, o_ref):
    """out = bias[idx] via a vector gather from a VMEM-resident table."""
    idx = idx_ref[...]                                     # (BR, 128) int32
    bias = bias_ref[0]                                     # (n_pad,) f32
    # TODO(synk): relies on Mosaic dynamic-gather lowering of jnp.take; for
    # tables too large for VMEM, stream table chunks with explicit DMAs.
    o_ref[...] = jnp.take(bias, idx, axis=0)


def one_linear_forward(values, weight):
    """Pallas implementation of OneLinear.forward.

    values: integer array of any shape
    weight: [n, 1] float32 embedding table (data_bias.weight)
    returns: float32 array matching `self.data_bias(values).squeeze()`.
    """
    orig_shape = values.shape
    idx = values.reshape(-1).astype(jnp.int32)
    b = idx.shape[0]
    n = weight.shape[0]

    if b == 0:   # empty input: nothing to gather
        return jnp.squeeze(jnp.zeros(orig_shape + (1,), jnp.float32))

    # Lane-dense layout: flat batch -> (rows, 128), tiled into (BR, 128) blocks.
    rows_needed = pl.cdiv(b, _LANES)
    if rows_needed <= _MAX_BLOCK_ROWS:
        block_rows = _round_up(rows_needed, 8)
        rows_total = block_rows
    else:
        block_rows = _MAX_BLOCK_ROWS
        rows_total = _round_up(rows_needed, block_rows)
    num_tiles = rows_total // block_rows
    b_pad = rows_total * _LANES

    if b_pad != b:
        idx = jnp.pad(idx, (0, b_pad - b))      # pad with index 0 (a valid row)
    idx2d = idx.reshape(rows_total, _LANES)

    idx_spec = pl.BlockSpec((block_rows, _LANES), lambda i: (i, 0))
    out_spec = pl.BlockSpec((block_rows, _LANES), lambda i: (i, 0))

    if n <= _SWEEP_MAX_N:
        kernel = functools.partial(_sweep_kernel, n)
        bias_arg = weight.reshape(-1).astype(jnp.float32)             # [n] in SMEM
        bias_spec = pl.BlockSpec(memory_space=pltpu.MemorySpace.SMEM)
    else:
        kernel = _take_kernel
        n_pad = _round_up(n, _LANES)
        bias_flat = weight.reshape(-1).astype(jnp.float32)
        bias_arg = jnp.pad(bias_flat, (0, n_pad - n)).reshape(1, n_pad)
        bias_spec = pl.BlockSpec((1, n_pad), lambda i: (0, 0))        # VMEM-resident

    out = pl.pallas_call(
        kernel,
        out_shape=jax.ShapeDtypeStruct((rows_total, _LANES), jnp.float32),
        grid_spec=pltpu.PrefetchScalarGridSpec(
            num_scalar_prefetch=0,
            grid=(num_tiles,),
            in_specs=[idx_spec, bias_spec],
            out_specs=out_spec,
        ),
        compiler_params=pltpu.CompilerParams(
            dimension_semantics=("parallel",)),
        cost_estimate=pl.CostEstimate(
            flops=0, transcendentals=0,
            bytes_accessed=4 * (b_pad + b_pad + n)),   # idx + out + table
    )(idx2d, bias_arg)

    out_flat = out.reshape(-1)
    if b_pad != b:
        out_flat = out_flat[:b]
    # torch `.squeeze()` removes every size-1 dim of [*values.shape, 1].
    return jnp.squeeze(out_flat.reshape(orig_shape + (1,)))


if __name__ == "__main__":
    n = 16
    root = jax.random.PRNGKey(0)
    k_w, k_v1, k_v2 = jax.random.split(root, 3)

    # nn.Embedding(n, 1) default init is N(0, 1); init_embedding() scales by 1e-3.
    weight = 0.001 * jax.random.normal(k_w, (n, 1), dtype=jnp.float32)

    # 2-D values (exercises flatten + ragged-tail padding in the wrapper).
    values_2d = jax.random.randint(k_v1, (4, 64), 0, n, dtype=jnp.int32)
    # 1-D values (typical OneLinear(batch,) usage).
    values_1d = jax.random.randint(k_v2, (8,), 0, n, dtype=jnp.int32)

    ok = True
    for values in (values_2d, values_1d):
        out = jax.block_until_ready(one_linear_forward(values, weight))
        ref = jnp.squeeze(weight[values])          # pure-JAX reference
        assert out.shape == ref.shape, (out.shape, ref.shape)
        ok &= bool(jnp.allclose(out, ref, atol=1e-7, rtol=0))
    assert ok, "kernel output mismatch vs reference"

    print("KERNEL_OK")
</pallas_src>

<mosaic_0001>
module attributes {stable_mosaic.version = 11 : i64} {
  func.func @_sweep_kernel(%arg0: i32, %arg1: memref<8x128xi32, #tpu.memory_space<vmem>>, %arg2: memref<16xf32, #tpu.memory_space<smem>>, %arg3: memref<8x128xf32, #tpu.memory_space<vmem>>) attributes {dimension_semantics = [#tpu.dimension_semantics<parallel>], iteration_bounds = array<i64: 1>, scalar_prefetch = 0 : i64, scratch_operands = 0 : i64, tpu.core_type = #tpu.core_type<tc>, window_params = [{transform_indices = @transform_0, window_bounds = array<i64: 8, 128>}, {transform_indices = @transform_1, window_bounds = array<i64: 16>}, {transform_indices = @transform_2, window_bounds = array<i64: 8, 128>}]} {
    %c0 = arith.constant 0 : index
    %c0_0 = arith.constant 0 : index
    %0 = vector.load %arg1[%c0, %c0_0] : memref<8x128xi32, #tpu.memory_space<vmem>>, vector<8x128xi32>
    %c0_1 = arith.constant 0 : index
    %1 = memref.load %arg2[%c0_1] : memref<16xf32, #tpu.memory_space<smem>>
    %2 = vector.broadcast %1 : f32 to vector<8x128xf32>
    %c1_i32 = arith.constant 1 : i32
    %3 = vector.broadcast %c1_i32 : i32 to vector<8x128xi32>
    %4 = arith.cmpi eq, %0, %3 : vector<8x128xi32>
    %c1 = arith.constant 1 : index
    %5 = memref.load %arg2[%c1] : memref<16xf32, #tpu.memory_space<smem>>
    %6 = vector.broadcast %5 : f32 to vector<8x128xf32>
    %7 = arith.select %4, %6, %2 : vector<8x128xi1>, vector<8x128xf32>
    %c2_i32 = arith.constant 2 : i32
    %8 = vector.broadcast %c2_i32 : i32 to vector<8x128xi32>
    %9 = arith.cmpi eq, %0, %8 : vector<8x128xi32>
    %c2 = arith.constant 2 : index
    %10 = memref.load %arg2[%c2] : memref<16xf32, #tpu.memory_space<smem>>
    %11 = vector.broadcast %10 : f32 to vector<8x128xf32>
    %12 = arith.select %9, %11, %7 : vector<8x128xi1>, vector<8x128xf32>
    %c3_i32 = arith.constant 3 : i32
    %13 = vector.broadcast %c3_i32 : i32 to vector<8x128xi32>
    %14 = arith.cmpi eq, %0, %13 : vector<8x128xi32>
    %c3 = arith.constant 3 : index
    %15 = memref.load %arg2[%c3] : memref<16xf32, #tpu.memory_space<smem>>
    %16 = vector.broadcast %15 : f32 to vector<8x128xf32>
    %17 = arith.select %14, %16, %12 : vector<8x128xi1>, vector<8x128xf32>
    %c4_i32 = arith.constant 4 : i32
    %18 = vector.broadcast %c4_i32 : i32 to vector<8x128xi32>
    %19 = arith.cmpi eq, %0, %18 : vector<8x128xi32>
    %c4 = arith.constant 4 : index
    %20 = memref.load %arg2[%c4] : memref<16xf32, #tpu.memory_space<smem>>
    %21 = vector.broadcast %20 : f32 to vector<8x128xf32>
    %22 = arith.select %19, %21, %17 : vector<8x128xi1>, vector<8x128xf32>
    %c5_i32 = arith.constant 5 : i32
    %23 = vector.broadcast %c5_i32 : i32 to vector<8x128xi32>
    %24 = arith.cmpi eq, %0, %23 : vector<8x128xi32>
    %c5 = arith.constant 5 : index
    %25 = memref.load %arg2[%c5] : memref<16xf32, #tpu.memory_space<smem>>
    %26 = vector.broadcast %25 : f32 to vector<8x128xf32>
    %27 = arith.select %24, %26, %22 : vector<8x128xi1>, vector<8x128xf32>
    %c6_i32 = arith.constant 6 : i32
    %28 = vector.broadcast %c6_i32 : i32 to vector<8x128xi32>
    %29 = arith.cmpi eq, %0, %28 : vector<8x128xi32>
    %c6 = arith.constant 6 : index
    %30 = memref.load %arg2[%c6] : memref<16xf32, #tpu.memory_space<smem>>
    %31 = vector.broadcast %30 : f32 to vector<8x128xf32>
    %32 = arith.select %29, %31, %27 : vector<8x128xi1>, vector<8x128xf32>
    %c7_i32 = arith.constant 7 : i32
    %33 = vector.broadcast %c7_i32 : i32 to vector<8x128xi32>
    %34 = arith.cmpi eq, %0, %33 : vector<8x128xi32>
    %c7 = arith.constant 7 : index
    %35 = memref.load %arg2[%c7] : memref<16xf32, #tpu.memory_space<smem>>
    %36 = vector.broadcast %35 : f32 to vector<8x128xf32>
    %37 = arith.select %34, %36, %32 : vector<8x128xi1>, vector<8x128xf32>
    %c8_i32 = arith.constant 8 : i32
    %38 = vector.broadcast %c8_i32 : i32 to vector<8x128xi32>
    %39 = arith.cmpi eq, %0, %38 : vector<8x128xi32>
    %c8 = arith.constant 8 : index
    %40 = memref.load %arg2[%c8] : memref<16xf32, #tpu.memory_space<smem>>
    %41 = vector.broadcast %40 : f32 to vector<8x128xf32>
    %42 = arith.select %39, %41, %37 : vector<8x128xi1>, vector<8x128xf32>
    %c9_i32 = arith.constant 9 : i32
    %43 = vector.broadcast %c9_i32 : i32 to vector<8x128xi32>
    %44 = arith.cmpi eq, %0, %43 : vector<8x128xi32>
    %c9 = arith.constant 9 : index
    %45 = memref.load %arg2[%c9] : memref<16xf32, #tpu.memory_space<smem>>
    %46 = vector.broadcast %45 : f32 to vector<8x128xf32>
    %47 = arith.select %44, %46, %42 : vector<8x128xi1>, vector<8x128xf32>
    %c10_i32 = arith.constant 10 : i32
    %48 = vector.broadcast %c10_i32 : i32 to vector<8x128xi32>
    %49 = arith.cmpi eq, %0, %48 : vector<8x128xi32>
    %c10 = arith.constant 10 : index
    %50 = memref.load %arg2[%c10] : memref<16xf32, #tpu.memory_space<smem>>
    %51 = vector.broadcast %50 : f32 to vector<8x128xf32>
    %52 = arith.select %49, %51, %47 : vector<8x128xi1>, vector<8x128xf32>
    %c11_i32 = arith.constant 11 : i32
    %53 = vector.broadcast %c11_i32 : i32 to vector<8x128xi32>
    %54 = arith.cmpi eq, %0, %53 : vector<8x128xi32>
    %c11 = arith.constant 11 : index
    %55 = memref.load %arg2[%c11] : memref<16xf32, #tpu.memory_space<smem>>
    %56 = vector.broadcast %55 : f32 to vector<8x128xf32>
    %57 = arith.select %54, %56, %52 : vector<8x128xi1>, vector<8x128xf32>
    %c12_i32 = arith.constant 12 : i32
    %58 = vector.broadcast %c12_i32 : i32 to vector<8x128xi32>
    %59 = arith.cmpi eq, %0, %58 : vector<8x128xi32>
    %c12 = arith.constant 12 : index
    %60 = memref.load %arg2[%c12] : memref<16xf32, #tpu.memory_space<smem>>
    %61 = vector.broadcast %60 : f32 to vector<8x128xf32>
    %62 = arith.select %59, %61, %57 : vector<8x128xi1>, vector<8x128xf32>
    %c13_i32 = arith.constant 13 : i32
    %63 = vector.broadcast %c13_i32 : i32 to vector<8x128xi32>
    %64 = arith.cmpi eq, %0, %63 : vector<8x128xi32>
    %c13 = arith.constant 13 : index
    %65 = memref.load %arg2[%c13] : memref<16xf32, #tpu.memory_space<smem>>
    %66 = vector.broadcast %65 : f32 to vector<8x128xf32>
    %67 = arith.select %64, %66, %62 : vector<8x128xi1>, vector<8x128xf32>
    %c14_i32 = arith.constant 14 : i32
    %68 = vector.broadcast %c14_i32 : i32 to vector<8x128xi32>
    %69 = arith.cmpi eq, %0, %68 : vector<8x128xi32>
    %c14 = arith.constant 14 : index
    %70 = memref.load %arg2[%c14] : memref<16xf32, #tpu.memory_space<smem>>
    %71 = vector.broadcast %70 : f32 to vector<8x128xf32>
    %72 = arith.select %69, %71, %67 : vector<8x128xi1>, vector<8x128xf32>
    %c15_i32 = arith.constant 15 : i32
    %73 = vector.broadcast %c15_i32 : i32 to vector<8x128xi32>
    %74 = arith.cmpi eq, %0, %73 : vector<8x128xi32>
    %c15 = arith.constant 15 : index
    %75 = memref.load %arg2[%c15] : memref<16xf32, #tpu.memory_space<smem>>
    %76 = vector.broadcast %75 : f32 to vector<8x128xf32>
    %77 = arith.select %74, %76, %72 : vector<8x128xi1>, vector<8x128xf32>
    %c0_2 = arith.constant 0 : index
    %c0_3 = arith.constant 0 : index
    %78 = vector.load %arg3[%c0_2, %c0_3] : memref<8x128xf32, #tpu.memory_space<vmem>>, vector<8x128xf32>
    tpu.vector_store %arg3[%c0_2, %c0_3], %77 {strides = array<i32>} : memref<8x128xf32, #tpu.memory_space<vmem>>, vector<8x128xf32>,
    return
  }
  func.func @transform_0(%arg0: i32) -> (i32, i32) {
    %c0_i32 = arith.constant 0 : i32
    %c0_i32_0 = arith.constant 0 : i32
    return %arg0, %c0_i32 : i32, i32
  }
  func.func @transform_1(%arg0: i32) -> i32 {
    %c0_i32 = arith.constant 0 : i32
    %c0_i32_0 = arith.constant 0 : i32
    return %c0_i32 : i32
  }
  func.func @transform_2(%arg0: i32) -> (i32, i32) {
    %c0_i32 = arith.constant 0 : i32
    %c0_i32_0 = arith.constant 0 : i32
    return %arg0, %c0_i32 : i32, i32
  }
}

</mosaic_0001>

<bundles_post_ra>
// kernel: tpu_custom_call.1
= control target key start
LH: loop header
LB: loop body
LE: loop exit
PB: predicated region body
PF: predicated region fallthrough
CT: control target
= control target key end

     0   :  { %7 = vsyncpa [#allocation3], 0  ;;  %s289_s0 = inlined_call_operand.hbm [shape: s32[8,128], index: 0, kind: input, shape index: {}]   ;;  %s290_s1 = inlined_call_operand.vmem [shape: f32[16], index: 1, kind: input, shape index: {}]   ;;  %s291_s2 = inlined_call_operand.hbm [shape: f32[8,128], index: 2, kind: output, shape index: {}]  }
   0x1   :  { %8 = vsyncpa [#allocation5], 0 }
   0x2   :  { %9 = vsyncpa [#allocation4], 0  ;;  %s26_s11 = sshll.u32 %s290_s1, 4  ;;  %s197_s12 = smov [#allocation2]   ;;  %s27_s11 = int_to_ptr.vmem [resolvable:$true] %s26_s11 }
   0x3   :  { %s16_s13 = sshll.u32 %s197_s12, 4  ;;  %s135_s16 = scalar_lea.hbm %s289_s0, 128  ;;  %s17_s13 = int_to_ptr.vmem [resolvable:$true] %s16_s13 }
   0x4   :  { %p136_p0 = scmp.ne.s32.totalorder %s289_s0, %s135_s16  ;;  %p139_p1 = scmp.lt.u32.totalorder %s135_s16, %s289_s0 }
   0x6   :  { %p141_p2 = pnand %p139_p1, %p136_p0 }
   0x8   :  { %144 = shalt.err (!%p141_p2)
}
   0x9   :  { %s145_s21 = scalar_lea.vmem %s17_s13, 128  ;;  %p150_p4 = scmp.lt.s32.totalorder %s17_s13, %s17_s13 }
   0xa   :  { %p146_p3 = scmp.ne.s32.totalorder %s17_s13, %s145_s21  ;;  %p151_p5 = scmp.lt.s32.totalorder %s145_s21, %s145_s21 }
   0xc   :  { %p152_p6 = por %p151_p5, %p150_p4 }
   0xe   :  { %p153_p7 = pnand %p152_p6, %p146_p3 }
  0x10   :  { %156 = shalt.err (!%p153_p7)
}
  0x11   :  { %19 = dma.hbm_to_vmem [thread:$0]  %s289_s0, 128, %s17_s13, [#allocation3]  }
  0x12   :  { %s157_s23 = scalar_lea.vmem %s27_s11, 16  ;;  %p162_p9 = scmp.lt.s32.totalorder %s27_s11, %s27_s11 }
  0x13   :  { %p158_p8 = scmp.ne.s32.totalorder %s27_s11, %s157_s23  ;;  %p163_p10 = scmp.lt.s32.totalorder %s157_s23, %s157_s23 }
  0x15   :  { %p164_p11 = por %p163_p10, %p162_p9 }
  0x17   :  { %p165_p12 = pnand %p164_p11, %p158_p8 }
  0x19   :  { %168 = shalt.err (!%p165_p12)
}
  0x1a   :  { %s198_s24 = smov [#allocation6]  }
  0x1b   :  { %29 = dma.vmem_to_smem %s27_s11, 16, %s198_s24, [#allocation5]  }
  0x1c   :  { %191 = dma.done.wait [#allocation3], 128  }
  0x1d   :  { %192 = vsyncadd [#allocation3], 4294967168 }
  0x1e   :  { %193 = dma.done.wait [#allocation5], 16  }
  0x1f   :  { %194 = vsyncadd [#allocation5], 4294967280 }
  0x20   :  { %36 = sfence }
  0x21   :  { %s38_s25 = sld [smem:[#allocation6]]  ;;  %s117_s26 = sld [smem:[#allocation6 + $0x1]]  ;;  %v230_v0 = vld [vmem:[#allocation2] sm:$0xff] }
  0x22   :  { %s118_s27 = sld [smem:[#allocation6 + $0x2]]  ;;  %s119_s0 = sld [smem:[#allocation6 + $0x3]]  ;;  %vm40_vm0 = vcmp.eq.s32.totalorder %v230_v0, 1  ;;  %vm44_vm1 = vcmp.eq.s32.totalorder %v230_v0, 2  ;;  %vm48_vm2 = vcmp.eq.s32.totalorder %v230_v0, 3  ;;  %vm52_vm3 = vcmp.eq.s32.totalorder %v230_v0, 4 }
  0x23   :  { %s120_s28 = sld [smem:[#allocation6 + $0x4]]  ;;  %s121_s29 = sld [smem:[#allocation6 + $0x5]]  ;;  %vm56_vm4 = vcmp.eq.s32.totalorder %v230_v0, 5  ;;  %vm60_vm5 = vcmp.eq.s32.totalorder %v230_v0, 6  ;;  %vm64_vm6 = vcmp.eq.s32.totalorder %v230_v0, 7  ;;  %vm68_vm7 = vcmp.eq.s32.totalorder %v230_v0, 8 }
  0x24   :  { %s232_s30 = sld [smem:[#allocation6 + $0x6]]  ;;  %s235_s3 = sld [smem:[#allocation6 + $0x7]]  ;;  %vm72_vm8 = vcmp.eq.s32.totalorder %v230_v0, 9  ;;  %vm76_vm9 = vcmp.eq.s32.totalorder %v230_v0, 10  ;;  %vm80_vm10 = vcmp.eq.s32.totalorder %v230_v0, 11  ;;  %vm84_vm11 = vcmp.eq.s32.totalorder %v230_v0, 12 }
  0x25   :  { %s237_s4 = sld [smem:[#allocation6 + $0x8]]  ;;  %s240_s5 = sld [smem:[#allocation6 + $0x9]]  ;;  %vm88_vm12 = vcmp.eq.s32.totalorder %v230_v0, 13  ;;  %vm92_vm13 = vcmp.eq.s32.totalorder %v230_v0, 14  ;;  %vm96_vm14 = vcmp.eq.s32.totalorder %v230_v0, 15 }
  0x26   :  { %s242_s6 = sld [smem:[#allocation6 + $0xa]]  ;;  %s245_s7 = sld [smem:[#allocation6 + $0xb]] }
  0x27   :  { %v39_v1 = vstv %s38_s25  ;;  %v42_v2 = vstv %s117_s26  ;;  %s248_s8 = sld [smem:[#allocation6 + $0xc]]  ;;  %s251_s9 = sld [smem:[#allocation6 + $0xd]] }
  0x28   :  { %v43_v3 = vsel %vm40_vm0, %v42_v2, %v39_v1  ;;  %v46_v4 = vstv %s118_s27  ;;  %v50_v6 = vstv %s119_s0  ;;  %s255_s10 = sld [smem:[#allocation6 + $0xe]]  ;;  %s259_s11 = sld [smem:[#allocation6 + $0xf]] }
  0x29   :  { %v47_v5 = vsel %vm44_vm1, %v46_v4, %v43_v3  ;;  %v54_v7 = vstv %s120_s28  ;;  %v58_v9 = vstv %s121_s29  ;;  %s199_s12 = smov [#allocation7]  }
  0x2a   :  { %v51_v8 = vsel %vm48_vm2, %v50_v6, %v47_v5  ;;  %v62_v10 = vstv %s232_s30  ;;  %v66_v12 = vstv %s235_s3  ;;  %s107_s13 = sshll.u32 %s199_s12, 4  ;;  %s108_s13 = int_to_ptr.vmem [resolvable:$true] %s107_s13 }
  0x2b   :  { %v55_v11 = vsel %vm52_vm3, %v54_v7, %v51_v8  ;;  %v70_v14 = vstv %s237_s4  ;;  %v74_v16 = vstv %s240_s5  ;;  %s169_s14 = scalar_lea.vmem %s108_s13, 128  ;;  %p174_p0 = scmp.lt.s32.totalorder %s108_s13, %s108_s13 }
  0x2c   :  { %v59_v13 = vsel %vm56_vm4, %v58_v9, %v55_v11  ;;  %v78_v18 = vstv %s242_s6  ;;  %v82_v20 = vstv %s245_s7  ;;  %p170_p13 = scmp.ne.s32.totalorder %s108_s13, %s169_s14  ;;  %p175_p1 = scmp.lt.s32.totalorder %s169_s14, %s169_s14 }
  0x2d   :  { %v63_v15 = vsel %vm60_vm5, %v62_v10, %v59_v13  ;;  %v86_v22 = vstv %s248_s8  ;;  %v90_v24 = vstv %s251_s9 }
  0x2e   :  { %v67_v17 = vsel %vm64_vm6, %v66_v12, %v63_v15  ;;  %v94_v26 = vstv %s255_s10  ;;  %v98_v28 = vstv %s259_s11  ;;  %p176_p2 = por %p175_p1, %p174_p0 }
  0x2f   :  { %v71_v19 = vsel %vm68_vm7, %v70_v14, %v67_v17 }
  0x30   :  { %v75_v21 = vsel %vm72_vm8, %v74_v16, %v71_v19  ;;  %p177_p3 = pnand %p176_p2, %p170_p13 }
  0x31   :  { %v79_v23 = vsel %vm76_vm9, %v78_v18, %v75_v21 }
  0x32   :  { %v83_v25 = vsel %vm80_vm10, %v82_v20, %v79_v23 }
  0x33   :  { %v87_v27 = vsel %vm84_vm11, %v86_v22, %v83_v25 }
  0x34   :  { %v91_v29 = vsel %vm88_vm12, %v90_v24, %v87_v27 }
  0x35   :  { %v95_v30 = vsel %vm92_vm13, %v94_v26, %v91_v29 }
  0x36   :  { %v99_v31 = vsel %vm96_vm14, %v98_v28, %v95_v30 }
  0x37   :  { %100 = vst [vmem:[#allocation7] sm:$0xff] %v99_v31 }
  0x38   :  { %180 = shalt.err (!%p177_p3)
}
  0x39   :  { %s181_s17 = scalar_lea.hbm %s291_s2, 128 }
  0x3a   :  { %p182_p4 = scmp.ne.s32.totalorder %s291_s2, %s181_s17  ;;  %p185_p5 = scmp.lt.u32.totalorder %s181_s17, %s291_s2 }
  0x3c   :  { %p187_p6 = pnand %p185_p5, %p182_p4 }
  0x3e   :  { %190 = shalt.err (!%p187_p6)
}
  0x3f   :  { %110 = dma.vmem_to_hbm [thread:$0]  %s108_s13, 128, %s291_s2, [#allocation4]  }
  0x40   :  { %195 = dma.done.wait [#allocation4], 128  }
  0x41   :  { %196 = vsyncadd [#allocation4], 4294967168 }
  0x42   :  { %114 = vsyncpa [#allocation3], 1 }
  0x43   :  { %115 = vsyncpa [#allocation4], 1 }
  0x44   :  { %116 = vsyncpa [#allocation5], 1 }

</bundles_post_ra>
